<compile_context>
chip_gen: v6e
topology: v6e:2x2x1
jax: 0.10.0
libtpu: 0.0.40
codegen_flags: <defaults>
</compile_context>

<pallas_src>
import functools

import jax
import jax.numpy as jnp
from jax.experimental import pallas as pl
from jax.experimental.pallas import tpu as pltpu

VOCAB = 2      # len(word_to_idx) = {'<PAD>', '<UNK>'}
EMB_DIM = 50
NUM_TAGS = 1   # len(tag_to_idx) = {'<PAD>'}

LANES = 128            # vreg lane width
MAX_TILE_ROWS = 4096   # (4096, 128) f32 tile = 2 MiB; fits all generations' scoped VMEM
SMALL_N_THRESHOLD = 100_000  # below this, plain XLA select beats custom-call overhead


def _round_down(a: int, b: int) -> int:
    return (a // b) * b


def fold_emission_params(emb_table, linear_w_t, linear_b):
    """Fold embedding + linear + bias into a (VOCAB,) lookup: m[v] = emb[v] @ W + b.

    Call once at parameter-load time (outside the hot forward path)."""
    m = (emb_table.astype(jnp.float32) @ linear_w_t.astype(jnp.float32)
         + linear_b.astype(jnp.float32))           # (V, T) = (2, 1)
    return m.reshape(-1)                            # (VOCAB,)


def _emissions_kernel(m_ref, ids_ref, out_ref):
    # m_ref:   SMEM (VOCAB,) float32   fused lookup scalars
    # ids_ref: VMEM (TR, 128) int32    token ids, lane-dense
    # out_ref: VMEM (TR, 128) float32  emissions, lane-dense
    ids = ids_ref[...]
    # Pure VPU select: id==0 -> m[0], else -> m[1].
    # (Out-of-range ids map to m[1] rather than erroring like torch.nn.Embedding.)
    out_ref[...] = jnp.where(ids == 0, m_ref[0], m_ref[1])


def _choose_tile_rows(rows: int) -> int:
    if rows <= 8:
        return rows  # single block equal to the full row extent (allowed by Mosaic)
    # Guarantee >= 2 programs when possible so v7x's two TensorCores both get work;
    # keep multiples of 8 (sublane) and cap at MAX_TILE_ROWS (VMEM / roofline sweet spot).
    half = max(8, _round_down(rows // 2, 8))
    return min(MAX_TILE_ROWS, half)


@functools.partial(jax.jit, static_argnames=("use_pallas",))
def crf_model_forward(x_ids, m, use_pallas=None):
    """x_ids: (B, S) int32 token ids; m: (VOCAB,) folded params.
    Returns emissions (B, S, NUM_TAGS) float32."""
    B, S = x_ids.shape
    N = B * S

    if x_ids.dtype != jnp.int32:
        # Callers should pass int32 ids to avoid this extra full pass over the input.
        x_ids = x_ids.astype(jnp.int32)

    if use_pallas is None:
        use_pallas = N >= SMALL_N_THRESHOLD
    if not use_pallas:
        # Small-N fast path: one fused XLA select, no custom-call boundary.
        return jnp.where(x_ids == 0, m[0], m[1])[..., None]

    # Lane-dense layout: rows of 128 lanes. Pad only to the next 128 boundary
    # (no padding / no output slice at all in the common case N % 128 == 0).
    rows = pl.cdiv(N, LANES)
    padded = rows * LANES
    ids_flat = x_ids.reshape(-1)
    if padded != N:
        ids_flat = jnp.pad(ids_flat, (0, padded - N))
    ids2d = ids_flat.reshape(rows, LANES)

    tile_rows = _choose_tile_rows(rows)
    grid = (pl.cdiv(rows, tile_rows),)  # Pallas masks the partial last block

    out = pl.pallas_call(
        _emissions_kernel,
        out_shape=jax.ShapeDtypeStruct((rows, LANES), jnp.float32),
        grid=grid,
        in_specs=[
            pl.BlockSpec(memory_space=pltpu.MemorySpace.SMEM),   # m: (VOCAB,) scalars
            pl.BlockSpec((tile_rows, LANES), lambda i: (i, 0)),  # ids tile
        ],
        out_specs=pl.BlockSpec((tile_rows, LANES), lambda i: (i, 0)),
        compiler_params=pltpu.CompilerParams(
            dimension_semantics=("parallel",),
        ),
    )(m, ids2d)

    if padded == N:
        return out.reshape(B, S, NUM_TAGS)        # free reshape, no HBM copy
    return out.reshape(-1)[:N].reshape(B, S, NUM_TAGS)


def _init_params(key):
    """Deterministic parameter init mirroring PyTorch default shapes."""
    k_emb, k_w, k_b = jax.random.split(key, 3)
    # nn.Embedding default: N(0, 1)
    emb_table = jax.random.normal(k_emb, (VOCAB, EMB_DIM), dtype=jnp.float32)
    # nn.Linear default: U(-1/sqrt(in), 1/sqrt(in)); stored transposed (E, T)
    bound = 1.0 / (EMB_DIM ** 0.5)
    linear_w_t = jax.random.uniform(
        k_w, (EMB_DIM, NUM_TAGS), minval=-bound, maxval=bound, dtype=jnp.float32)
    linear_b = jax.random.uniform(
        k_b, (NUM_TAGS,), minval=-bound, maxval=bound, dtype=jnp.float32)
    return emb_table, linear_w_t, linear_b


# TODO(synk): the CRF layer of the original module is constructed but never used in
# forward(); it is intentionally not implemented here.


if __name__ == "__main__":
    key = jax.random.PRNGKey(0)
    k_params, k_ids = jax.random.split(key)

    emb_table, linear_w_t, linear_b = _init_params(k_params)
    # Fold embedding + linear + bias once, outside the hot path.
    m = fold_emission_params(emb_table, linear_w_t, linear_b)

    # Small input consistent with the module: (batch=2, seq=8) token ids in [0, VOCAB)
    B, S = 2, 8
    x_ids = jax.random.randint(k_ids, (B, S), 0, VOCAB, dtype=jnp.int32)

    # Force the Pallas path so the kernel actually runs at this small shape.
    emissions = crf_model_forward(x_ids, m, use_pallas=True)
    emissions = jax.block_until_ready(emissions)

    # Pure-JAX reference check (embedding gather + linear).
    ref = jnp.take(emb_table, x_ids, axis=0) @ linear_w_t + linear_b
    assert emissions.shape == (B, S, NUM_TAGS)
    assert jnp.allclose(emissions, ref, atol=1e-5, rtol=1e-5)

    # Auto-dispatch (small-N fast path) must agree with the kernel path.
    emissions_fast = jax.block_until_ready(crf_model_forward(x_ids, m))
    assert jnp.allclose(emissions_fast, ref, atol=1e-5, rtol=1e-5)

    print("KERNEL_OK")
</pallas_src>

<mosaic_0001>
module attributes {stable_mosaic.version = 11 : i64} {
  func.func @_emissions_kernel(%arg0: i32, %arg1: memref<2xf32, #tpu.memory_space<smem>>, %arg2: memref<1x128xi32, #tpu.memory_space<vmem>>, %arg3: memref<1x128xf32, #tpu.memory_space<vmem>>) attributes {dimension_semantics = [#tpu.dimension_semantics<parallel>], iteration_bounds = array<i64: 1>, scalar_prefetch = 0 : i64, scratch_operands = 0 : i64, tpu.core_type = #tpu.core_type<tc>, window_params = [{transform_indices = @transform_0, window_bounds = array<i64: 2>}, {transform_indices = @transform_1, window_bounds = array<i64: 1, 128>}, {transform_indices = @transform_2, window_bounds = array<i64: 1, 128>}]} {
    %c0 = arith.constant 0 : index
    %c0_0 = arith.constant 0 : index
    %0 = vector.load %arg2[%c0, %c0_0] : memref<1x128xi32, #tpu.memory_space<vmem>>, vector<1x128xi32>
    %c0_i32 = arith.constant 0 : i32
    %1 = vector.broadcast %c0_i32 : i32 to vector<1x128xi32>
    %2 = arith.cmpi eq, %0, %1 : vector<1x128xi32>
    %c0_1 = arith.constant 0 : index
    %3 = memref.load %arg1[%c0_1] : memref<2xf32, #tpu.memory_space<smem>>
    %c1 = arith.constant 1 : index
    %4 = memref.load %arg1[%c1] : memref<2xf32, #tpu.memory_space<smem>>
    %5 = vector.broadcast %3 : f32 to vector<1x128xf32>
    %6 = vector.broadcast %4 : f32 to vector<1x128xf32>
    %7 = arith.select %2, %5, %6 : vector<1x128xi1>, vector<1x128xf32>
    %c0_2 = arith.constant 0 : index
    %c0_3 = arith.constant 0 : index
    %8 = vector.load %arg3[%c0_2, %c0_3] : memref<1x128xf32, #tpu.memory_space<vmem>>, vector<1x128xf32>
    tpu.vector_store %arg3[%c0_2, %c0_3], %7 {strides = array<i32>} : memref<1x128xf32, #tpu.memory_space<vmem>>, vector<1x128xf32>,
    return
  }
  func.func @transform_0(%arg0: i32) -> i32 {
    %c0_i32 = arith.constant 0 : i32
    %c0_i32_0 = arith.constant 0 : i32
    return %c0_i32 : i32
  }
  func.func @transform_1(%arg0: i32) -> (i32, i32) {
    %c0_i32 = arith.constant 0 : i32
    %c0_i32_0 = arith.constant 0 : i32
    return %arg0, %c0_i32 : i32, i32
  }
  func.func @transform_2(%arg0: i32) -> (i32, i32) {
    %c0_i32 = arith.constant 0 : i32
    %c0_i32_0 = arith.constant 0 : i32
    return %arg0, %c0_i32 : i32, i32
  }
}

</mosaic_0001>

<bundles_post_ra>
// kernel: crf_model_forward.1
= control target key start
LH: loop header
LB: loop body
LE: loop exit
PB: predicated region body
PF: predicated region fallthrough
CT: control target
= control target key end

     0   :  { %7 = vsyncpa [#allocation3], 0  ;;  %s78_s0 = inlined_call_operand.vmem [shape: f32[2], index: 0, kind: input, shape index: {}]   ;;  %s79_s1 = inlined_call_operand.vmem [shape: s32[1,128], index: 1, kind: input, shape index: {}]   ;;  %s80_s2 = inlined_call_operand.vmem [shape: f32[1,128], index: 2, kind: output, shape index: {}]  }
   0x1   :  { %s14_s11 = sshll.u32 %s78_s0, 4  ;;  %s15_s11 = int_to_ptr.vmem [resolvable:$true] %s14_s11 }
   0x2   :  { %s39_s12 = scalar_lea.vmem %s15_s11, 16  ;;  %p44_p1 = scmp.lt.s32.totalorder %s15_s11, %s15_s11 }
   0x3   :  { %p40_p0 = scmp.ne.s32.totalorder %s15_s11, %s39_s12  ;;  %p45_p2 = scmp.lt.s32.totalorder %s39_s12, %s39_s12 }
   0x5   :  { %p46_p3 = por %p45_p2, %p44_p1 }
   0x7   :  { %p47_p4 = pnand %p46_p3, %p40_p0 }
   0x9   :  { %50 = shalt.err (!%p47_p4)
}
   0xa   :  { %s53_s13 = smov [#allocation2]  }
   0xb   :  { %17 = dma.vmem_to_smem %s15_s11, 16, %s53_s13, [#allocation3]  }
   0xc   :  { %51 = dma.done.wait [#allocation3], 16  }
   0xd   :  { %52 = vsyncadd [#allocation3], 4294967280 }
   0xe   :  { %23 = sfence }
   0xf   :  { %s26_s14 = sld [smem:[#allocation2]]  ;;  %v24_v0 = vld [vmem:[%s79_s1] sm:$0x1] }
  0x10   :  { %s37_s15 = sld [smem:[#allocation2 + $0x1]]  ;;  %vm25_vm0 = vcmp.eq.s32.totalorder %v24_v0, 0 }
  0x15   :  { %v28_v1 = vstv %s26_s14 }
  0x16   :  { %v29_v2 = vstv %s37_s15 }
  0x17   :  { %v30_v3 = vsel %vm25_vm0, %v28_v1, %v29_v2 }
  0x18   :  { %31 = vst [vmem:[%s80_s2] sm:$0x1] %v30_v3 }
  0x19   :  { %36 = vsyncpa [#allocation3], 1 }

</bundles_post_ra>
